<compile_context>
chip_gen: v6e
topology: v6e:2x2x1
jax: 0.10.0
libtpu: 0.0.40
codegen_flags: <defaults>
</compile_context>

<pallas_src>
import jax
import jax.numpy as jnp
from jax.experimental import pallas as pl
from jax.experimental.pallas import tpu as pltpu


def make_deep_kernel(num_layers):
    """Kernel over one batch tile: chain of (x @ W_l^T + b_l) with f32 accumulation."""

    def kernel(x_ref, *refs):
        # refs = (w0, b0, w1, b1, ..., y_ref); weights are pre-transposed (in, out).
        y_ref = refs[-1]
        wb = refs[:-1]
        h = x_ref[...].astype(jnp.float32)
        for l in range(num_layers):
            w = wb[2 * l][...]
            b = wb[2 * l + 1][...]
            h = jnp.dot(h, w, preferred_element_type=jnp.float32) + b
        y_ref[...] = h.astype(y_ref.dtype)

    return kernel


def deep_forward(x, params, *, tile_b=256):
    """Pallas forward for Deep.

    Args:
      x:      (B, hidden_layers[0]) f32 input.
      params: list of (W, b) in PyTorch nn.Linear layout, W is (out, in).
      tile_b: batch tile (multiple of 8; large tiles keep the MXU fed and
              amortize the ~0.35 us per-grid-step overhead).
    """
    B, D_in = x.shape
    num_layers = len(params)
    D_out = params[-1][0].shape[0]

    # Glue: pre-transpose (out, in) -> (in, out); biases as (1, out) rows.
    flat = []
    for w, b in params:
        flat.append(jnp.asarray(w).T)                     # (in, out)
        flat.append(jnp.asarray(b).reshape(1, -1))        # (1, out)

    tile_b = min(tile_b, B)
    assert tile_b % 8 == 0, "tile_b must be a multiple of 8 (sublane granularity)"
    assert B % tile_b == 0, "batch must be a multiple of tile_b"
    grid = (B // tile_b,)

    def full(a):
        # Weights / biases: whole-array block, same block every grid step
        # (resident in VMEM across the batch loop).
        return pl.BlockSpec(a.shape, lambda i: (0,) * a.ndim)

    return pl.pallas_call(
        make_deep_kernel(num_layers),
        out_shape=jax.ShapeDtypeStruct((B, D_out), jnp.float32),
        grid_spec=pltpu.PrefetchScalarGridSpec(
            num_scalar_prefetch=0,
            grid=grid,
            in_specs=[pl.BlockSpec((tile_b, D_in), lambda i: (i, 0))]
            + [full(a) for a in flat],
            out_specs=pl.BlockSpec((tile_b, D_out), lambda i: (i, 0)),
        ),
        compiler_params=pltpu.CompilerParams(
            dimension_semantics=("parallel",),
        ),
    )(x, *flat)


def init_params(key, hidden_layers):
    """Deterministic synthetic parameters (PyTorch nn.Linear layout: W is (out, in))."""
    layers = list(zip(hidden_layers[:-1], hidden_layers[1:]))
    keys = jax.random.split(key, 2 * len(layers))
    params = []
    for li, (fin, fout) in enumerate(layers):
        kw, kb = keys[2 * li], keys[2 * li + 1]
        w = jax.random.normal(kw, (fout, fin), jnp.float32) * 0.1
        b = jax.random.normal(kb, (fout,), jnp.float32) * 0.01
        params.append((w, b))
    return params


def deep_reference(x, params):
    """Pure-JAX reference mirroring the PyTorch forward (dropout_p = 0)."""
    h = x
    for w, b in params:
        h = h @ w.T + b
    return h


if __name__ == "__main__":
    # Shapes consistent with the module docstring example: hidden_layers=[128, 64, 32].
    hidden_layers = [128, 64, 32]
    batch = 512                      # 2 grid steps at tile_b=256 (both v7x TCs busy)

    key = jax.random.PRNGKey(0)
    kx, kp = jax.random.split(key)
    x = jax.random.normal(kx, (batch, hidden_layers[0]), jnp.float32)
    params = init_params(kp, hidden_layers)

    y = deep_forward(x, params, tile_b=256)
    y = jax.block_until_ready(y)

    y_ref = deep_reference(x, params)
    assert y.shape == (batch, hidden_layers[-1])
    assert jnp.allclose(y, y_ref, atol=1e-4, rtol=1e-4), "mismatch vs JAX reference"

    print("KERNEL_OK")
</pallas_src>

<mosaic_0001>
module attributes {stable_mosaic.version = 11 : i64} {
  func.func @kernel(%arg0: i32, %arg1: memref<256x128xf32, #tpu.memory_space<vmem>>, %arg2: memref<128x64xf32, #tpu.memory_space<vmem>>, %arg3: memref<1x64xf32, #tpu.memory_space<vmem>>, %arg4: memref<64x32xf32, #tpu.memory_space<vmem>>, %arg5: memref<1x32xf32, #tpu.memory_space<vmem>>, %arg6: memref<256x32xf32, #tpu.memory_space<vmem>>) attributes {dimension_semantics = [#tpu.dimension_semantics<parallel>], iteration_bounds = array<i64: 2>, scalar_prefetch = 0 : i64, scratch_operands = 0 : i64, tpu.core_type = #tpu.core_type<tc>, window_params = [{transform_indices = @transform_0, window_bounds = array<i64: 256, 128>}, {pipeline_mode = #tpu.pipeline_mode<synchronous>, transform_indices = @transform_1, window_bounds = array<i64: 128, 64>}, {pipeline_mode = #tpu.pipeline_mode<synchronous>, transform_indices = @transform_2, window_bounds = array<i64: 1, 64>}, {pipeline_mode = #tpu.pipeline_mode<synchronous>, transform_indices = @transform_3, window_bounds = array<i64: 64, 32>}, {pipeline_mode = #tpu.pipeline_mode<synchronous>, transform_indices = @transform_4, window_bounds = array<i64: 1, 32>}, {transform_indices = @transform_5, window_bounds = array<i64: 256, 32>}]} {
    %c0 = arith.constant 0 : index
    %c0_0 = arith.constant 0 : index
    %0 = vector.load %arg1[%c0, %c0_0] : memref<256x128xf32, #tpu.memory_space<vmem>>, vector<256x128xf32>
    %c0_1 = arith.constant 0 : index
    %c0_2 = arith.constant 0 : index
    %1 = vector.load %arg2[%c0_1, %c0_2] : memref<128x64xf32, #tpu.memory_space<vmem>>, vector<128x64xf32>
    %c0_3 = arith.constant 0 : index
    %c0_4 = arith.constant 0 : index
    %2 = vector.load %arg3[%c0_3, %c0_4] : memref<1x64xf32, #tpu.memory_space<vmem>>, vector<1x64xf32>
    %cst = arith.constant dense<0.000000e+00> : vector<256x64xf32>
    %3 = tpu.matmul %0, %1, %cst {dimension_numbers = #tpu.dot_dimension_numbers<[1], [0], [0], [1], [0, 0, 1, 1], [], []>} : vector<256x128xf32>, vector<128x64xf32>, vector<256x64xf32> -> vector<256x64xf32>
    %4 = vector.broadcast %2 : vector<1x64xf32> to vector<256x64xf32>
    %5 = arith.addf %3, %4 : vector<256x64xf32>
    %c0_5 = arith.constant 0 : index
    %c0_6 = arith.constant 0 : index
    %6 = vector.load %arg4[%c0_5, %c0_6] : memref<64x32xf32, #tpu.memory_space<vmem>>, vector<64x32xf32>
    %c0_7 = arith.constant 0 : index
    %c0_8 = arith.constant 0 : index
    %7 = vector.load %arg5[%c0_7, %c0_8] : memref<1x32xf32, #tpu.memory_space<vmem>>, vector<1x32xf32>
    %cst_9 = arith.constant dense<0.000000e+00> : vector<256x32xf32>
    %8 = tpu.matmul %5, %6, %cst_9 {dimension_numbers = #tpu.dot_dimension_numbers<[1], [0], [0], [1], [0, 0, 1, 1], [], []>} : vector<256x64xf32>, vector<64x32xf32>, vector<256x32xf32> -> vector<256x32xf32>
    %9 = vector.broadcast %7 : vector<1x32xf32> to vector<256x32xf32>
    %10 = arith.addf %8, %9 : vector<256x32xf32>
    %c0_10 = arith.constant 0 : index
    %c0_11 = arith.constant 0 : index
    %11 = vector.load %arg6[%c0_10, %c0_11] : memref<256x32xf32, #tpu.memory_space<vmem>>, vector<256x32xf32>
    tpu.vector_store %arg6[%c0_10, %c0_11], %10 {strides = array<i32>} : memref<256x32xf32, #tpu.memory_space<vmem>>, vector<256x32xf32>,
    return
  }
  func.func @transform_0(%arg0: i32) -> (i32, i32) {
    %c0_i32 = arith.constant 0 : i32
    %c0_i32_0 = arith.constant 0 : i32
    return %arg0, %c0_i32 : i32, i32
  }
  func.func @transform_1(%arg0: i32) -> (i32, i32) {
    %c0_i32 = arith.constant 0 : i32
    %c0_i32_0 = arith.constant 0 : i32
    %c0_i32_1 = arith.constant 0 : i32
    return %c0_i32, %c0_i32_0 : i32, i32
  }
  func.func @transform_2(%arg0: i32) -> (i32, i32) {
    %c0_i32 = arith.constant 0 : i32
    %c0_i32_0 = arith.constant 0 : i32
    %c0_i32_1 = arith.constant 0 : i32
    return %c0_i32, %c0_i32_0 : i32, i32
  }
  func.func @transform_3(%arg0: i32) -> (i32, i32) {
    %c0_i32 = arith.constant 0 : i32
    %c0_i32_0 = arith.constant 0 : i32
    %c0_i32_1 = arith.constant 0 : i32
    return %c0_i32, %c0_i32_0 : i32, i32
  }
  func.func @transform_4(%arg0: i32) -> (i32, i32) {
    %c0_i32 = arith.constant 0 : i32
    %c0_i32_0 = arith.constant 0 : i32
    %c0_i32_1 = arith.constant 0 : i32
    return %c0_i32, %c0_i32_0 : i32, i32
  }
  func.func @transform_5(%arg0: i32) -> (i32, i32) {
    %c0_i32 = arith.constant 0 : i32
    %c0_i32_0 = arith.constant 0 : i32
    return %arg0, %c0_i32 : i32, i32
  }
}

</mosaic_0001>

<bundles_post_ra>
// kernel: tpu_custom_call.1
= control target key start
LH: loop header
LB: loop body
LE: loop exit
PB: predicated region body
PF: predicated region fallthrough
CT: control target
= control target key end

     0   :  { %10 = vsyncpa [#allocation3], 0  ;;  %s1760_s0 = inlined_call_operand.hbm [shape: f32[512,128], index: 0, kind: input, shape index: {}]   ;;  %s1761_s1 = inlined_call_operand.vmem [shape: f32[128,64], index: 1, kind: input, shape index: {}]   ;;  %s1762_s2 = inlined_call_operand.vmem [shape: f32[1,64], index: 2, kind: input, shape index: {}]   ;;  %s1763_s3 = inlined_call_operand.vmem [shape: f32[64,32], index: 3, kind: input, shape index: {}]   ;;  %s1764_s4 = inlined_call_operand.vmem [shape: f32[1,32], index: 4, kind: input, shape index: {}]   ;;  %s1765_s5 = inlined_call_operand.vmem [shape: f32[512,32], index: 5, kind: output, shape index: {}]  }
   0x1   :  { %12 = vsyncpa [#allocation3 + $0x1], 0  ;;  %s1382_s18 = smov 0   ;;  %s1384_s19 = smov 0  }
   0x2   :  { %s1386_s20 = smov 0   ;;  %s1388_s21 = smov 0  }
   0x3 LB: > { %s964_s22 = sadd.s32 4294967295, %s1347_s21   ;;  %s1402_s23 = sadd.s32 1, %s1347_s21   ;;  %s1347_s21 = sphi %s1388_s21, %s1774_s21   ;;  %s1343_s20 = sphi %s1386_s20, %s1773_s20   ;;  %s1339_s19 = sphi %s1384_s19, %s1772_s19   ;;  %s1335_s18 = sphi %s1382_s18, %s1771_s18  }
   0x4   : > { %s22_s24 = ssub.s32 %s1347_s21, %s1402_s23  ;;  %s25_s25 = sadd.s32 1, %s1343_s20 }
   0x5   : > { %p23_p0 = scmp.eq.s32.totalorder %s22_s24, 0  ;;  %p32_p1 = scmp.ne.s32.totalorder %s1343_s20, %s1339_s19 }
   0x6   : > { %p33_p2 = scmp.eq.s32.totalorder %s1347_s21, 0  ;;  %p38_p3 = scmp.ne.s32.totalorder %s1339_s19, %s1335_s18 }
   0x7   : > { %s1412_s26 = scalar_select %p23_p0, %s1343_s20, %s25_s25  }
   0x8   : > { %p34_p4 = por %p33_p2, %p32_p1  ;;  %p39_p5 = scmp.eq.s32.totalorder %s964_s22, 0 }
   0x9   : > { %p1250_p6 = scmp.lt.s32.totalorder %s1347_s21, 2  ;;  %s184_s28 = sand.u32 1, %s1343_s20  }
   0xa   : > { %p1417_p7 = por %p39_p5, %p38_p3  ;;  %s968_s29 = sshll.u32 %s184_s28, 8 }
   0xb   : > { %s1011_s30 = sshll.u32 %s1347_s21, 12  ;;  %s188_s9 = scalar_lea.vmem [#allocation2], %s968_s29 }
   0xc   : > { %s1767_s27 = scalar_select %p1417_p7, 1, 0 }
   0xd   : > { %s1426_s8 = scalar_lea.hbm %s1760_s0, %s1011_s30  ;;  %s195_s10 = sshll.u32 %s188_s9, 4  ;;  %s1428_s10 = int_to_ptr.vmem [resolvable:$true] %s195_s10 }
   0xe   : > { %p1430_p8 = pnand %p1250_p6, %p34_p4  ;;  %s1435_s12 = scalar_lea.sflag [#allocation3], %s184_s28 }
   0xf   : > { %s1285_s13 = scalar_lea.hbm %s1426_s8, 4096  ;;  %s1290_s16 = scalar_lea.hbm %s1760_s0, 8192 }
  0x10   : > { %p1286_p10 = scmp.ne.s32.totalorder %s1426_s8, %s1285_s13  ;;  %p1287_p11 = pneg %p1430_p8 }
  0x11   : > { %p1291_p0 = scmp.lt.s32.totalorder %s1426_s8, %s1760_s0  ;;  %p1292_p1 = scmp.lt.s32.totalorder %s1290_s16, %s1285_s13 }
  0x12   : > { %p1288_p12 = pnand %p1287_p11, %p1286_p10 }
  0x13   : > { %p1293_p2 = por %p1292_p1, %p1291_p0 }
  0x14   : > { %p1289_p13 = pneg %p1288_p12 }
  0x16   : > { %p1294_p3 = pnand %p1293_p2, %p1289_p13 }
  0x18   : > { %1297 = shalt.err (!%p1294_p3)
}
  0x19   : > { %s1298_s24 = scalar_lea.vmem %s1428_s10, 4096  ;;  %s1349_s25 = smov [#allocation2]  }
  0x1a   : > { %p1299_p4 = scmp.ne.s32.totalorder %s1428_s10, %s1298_s24  ;;  %s1303_s28 = sshll.u32 %s1349_s25, 4  ;;  %s1304_s28 = int_to_ptr.vmem [resolvable:$false] %s1303_s28 }
  0x1b   : > { %s1305_s29 = scalar_lea.vmem %s1304_s28, 8192  ;;  %p1306_p10 = scmp.lt.s32.totalorder %s1428_s10, %s1304_s28 }
  0x1c   : > { %p1301_p5 = pnand %p1299_p4, %p1287_p11  ;;  %p1307_p12 = scmp.lt.s32.totalorder %s1305_s29, %s1298_s24 }
  0x1e   : > { %p1302_p6 = pneg %p1301_p5  ;;  %p1308_p9 = por %p1307_p12, %p1306_p10 }
  0x20   : > { %p1309_p7 = pnand %p1308_p9, %p1302_p6 }
  0x22   : > { %1312 = shalt.err (!%p1309_p7)
}
  0x23   : > { %s1350_s30 = smov 128   ;;  %s1351_s6 = smov 8  }
  0x24   : > { %1249 = dma.hbm_to_vmem [thread:$0]  (!%p1430_p8), %s1426_s8, 4096, %s1428_s10, %s1435_s12, %s1350_s30, %s1350_s30, %s1351_s6  }
  0x25   : > { %p203_p11 = scmp.lt.s32.totalorder %s1347_s21, 3  ;;  %p1769_p13 = scmp.ge.s32.totalorder %s1347_s21, 1 }
  0x27   : > { %p204_p0 = pnand %p1769_p13, %p203_p11 }
  0x28   : > { %s209_s7 = sand.u32 (!%p204_p0), 1, %s1339_s19   ;;  %p1770_p7 = scmp.ne.s32.totalorder (!%p204_p0), %s1767_s27, 0 }
  0x29   : > { %207 = sbr.rel (%p204_p0) target bundleno = 536 (0x218), region = 40  ;;  %s972_s9 = sshll.u32 (!%p204_p0), %s209_s7, 8 }
  0x2a   : > { %s210_s13 = scalar_lea.sflag (!%p204_p0), [#allocation3], %s209_s7  ;;  %s1460_s14 = scalar_lea.vmem (!%p204_p0), [#allocation2], %s972_s9 }
  0x2e   : > { %1330 = dma.done.wait (%p1770_p7), %s210_s13, 4096  }
  0x2f   : > { %1332 = vsyncadd (%p1770_p7), %s210_s13, 4294963200  ;;  %v294_v0 = vld [vmem:[%s1761_s1 + $0x78] sm:$0xff]  ;;  %v293_v1 = vld [vmem:[%s1761_s1 + $0x70] sm:$0xff]  ;;  %vm542_vm0 = vcmask 523264   ;;  %s973_s30 = sshll.u32 %s964_s22, 5  ;;  %vm864_vm1 = vcmask 261120  }
  0x30   : > { %1100 = vmatprep.subr.mxu0 %v294_v0  ;;  %v292_v2 = vld [vmem:[%s1761_s1 + $0x68] sm:$0xff]  ;;  %v291_v3 = vld [vmem:[%s1761_s1 + $0x60] sm:$0xff]  ;;  %v290_v5 = vld [vmem:[%s1761_s1 + $0x58] sm:$0xff]  ;;  %p242_p8 = scmp.lt.s32.totalorder %s973_s30, 63 }
  0x31   : > { %1101 = vmatpush3.msra.mxu0 %v294_v0  ;;  %v247_v4 = vld [vmem:[%s1460_s14] sm:$0xff]  ;;  %v289_v6 = vld [vmem:[%s1761_s1 + $0x50] sm:$0xff]  ;;  %v288_v7 = vld [vmem:[%s1761_s1 + $0x48] sm:$0xff] }
  0x32   : > { %1102 = vmatprep.subr.mxu0 %v293_v1  ;;  %1132 = vmatprep.mubr.f32.mxu0 %v247_v4  ;;  %v287_v8 = vld [vmem:[%s1761_s1 + $0x40] sm:$0xff]  ;;  %v286_v9 = vld [vmem:[%s1761_s1 + $0x38] sm:$0xff]  ;;  %v285_v10 = vld [vmem:[%s1761_s1 + $0x30] sm:$0xff]  ;;  %s1776_s30 = smov (!%p242_p8, %s973_s30), 63 }
  0x33   : > { %1103 = vmatpush3.msra.mxu0 %v293_v1  ;;  %v534_v11 = vld [vmem:[%s1763_s3 + $0x38] sm:$0xff]  ;;  %v533_v12 = vld [vmem:[%s1763_s3 + $0x30] sm:$0xff]  ;;  %v284_v13 = vld [vmem:[%s1761_s1 + $0x28] sm:$0xff]  ;;  %s974_s6 = sshll.u32 %s1776_s30, 3 }
  0x34   : > { %1104 = vmatprep.subr.mxu0 %v292_v2  ;;  %1180 = vmatprep.subr.mxu1 %v534_v11  ;;  %v532_v14 = vld [vmem:[%s1763_s3 + $0x28] sm:$0xff]  ;;  %v283_v15 = vld [vmem:[%s1761_s1 + $0x20] sm:$0xff]  ;;  %v282_v17 = vld [vmem:[%s1761_s1 + $0x18] sm:$0xff]  ;;  %s1649_s16 = scalar_lea.vmem %s1765_s5, %s974_s6 }
  0x35   : > { %1105 = vmatpush3.msra.mxu0 %v292_v2  ;;  %1181 = vmatpush3.msra.mxu1 %v534_v11  ;;  %v531_v16 = vld [vmem:[%s1763_s3 + $0x20] sm:$0xff]  ;;  %v530_v18 = vld [vmem:[%s1763_s3 + $0x18] sm:$0xff]  ;;  %v281_v19 = vld [vmem:[%s1761_s1 + $0x10] sm:$0xff] }
  0x36   : > { %1106 = vmatprep.subr.mxu0 %v291_v3  ;;  %1182 = vmatprep.subr.mxu1 %v533_v12  ;;  %v280_v20 = vld [vmem:[%s1761_s1 + $0x8] sm:$0xff]  ;;  %v279_v21 = vld [vmem:[%s1761_s1] sm:$0xff]  ;;  %v249_v23 = vld [vmem:[%s1460_s14 + $0x10] sm:$0xff] }
  0x37   : > { %1107 = vmatpush3.msra.mxu0 %v291_v3  ;;  %1183 = vmatpush3.msra.mxu1 %v533_v12  ;;  %v248_v22 = vld [vmem:[%s1460_s14 + $0x8] sm:$0xff]  ;;  %v250_v24 = vld [vmem:[%s1460_s14 + $0x18] sm:$0xff]  ;;  %v251_v25 = vld [vmem:[%s1460_s14 + $0x20] sm:$0xff] }
  0x38   : > { %1108 = vmatprep.subr.mxu0 %v290_v5  ;;  %1184 = vmatprep.subr.mxu1 %v532_v14  ;;  %v252_v26 = vld [vmem:[%s1460_s14 + $0x28] sm:$0xff]  ;;  %v253_v27 = vld [vmem:[%s1460_s14 + $0x30] sm:$0xff]  ;;  %v254_v28 = vld [vmem:[%s1460_s14 + $0x38] sm:$0xff] }
  0x39   : > { %1109 = vmatpush3.msra.mxu0 %v290_v5  ;;  %1185 = vmatpush3.msra.mxu1 %v532_v14  ;;  %v255_v29 = vld [vmem:[%s1460_s14 + $0x40] sm:$0xff]  ;;  %v256_v30 = vld [vmem:[%s1460_s14 + $0x48] sm:$0xff]  ;;  %v257_v31 = vld [vmem:[%s1460_s14 + $0x50] sm:$0xff] }
  0x3a   : > { %1110 = vmatprep.subr.mxu0 %v289_v6  ;;  %1186 = vmatprep.subr.mxu1 %v531_v16  ;;  %v258_v32 = vld [vmem:[%s1460_s14 + $0x58] sm:$0xff]  ;;  %v259_v33 = vld [vmem:[%s1460_s14 + $0x60] sm:$0xff]  ;;  %v260_v34 = vld [vmem:[%s1460_s14 + $0x68] sm:$0xff] }
  0x3b   : > { %1111 = vmatpush3.msra.mxu0 %v289_v6  ;;  %1187 = vmatpush3.msra.mxu1 %v531_v16  ;;  %v261_v35 = vld [vmem:[%s1460_s14 + $0x70] sm:$0xff]  ;;  %v262_v36 = vld [vmem:[%s1460_s14 + $0x78] sm:$0xff]  ;;  %v263_v37 = vld [vmem:[%s1460_s14 + $0x80] sm:$0xff] }
  0x3c   : > { %1112 = vmatprep.subr.mxu0 %v288_v7  ;;  %1188 = vmatprep.subr.mxu1 %v530_v18  ;;  %v264_v38 = vld [vmem:[%s1460_s14 + $0x88] sm:$0xff]  ;;  %v265_v39 = vld [vmem:[%s1460_s14 + $0x90] sm:$0xff]  ;;  %v266_v40 = vld [vmem:[%s1460_s14 + $0x98] sm:$0xff] }
  0x3d   : > { %1113 = vmatpush3.msra.mxu0 %v288_v7  ;;  %1189 = vmatpush3.msra.mxu1 %v530_v18  ;;  %v267_v41 = vld [vmem:[%s1460_s14 + $0xa0] sm:$0xff]  ;;  %v268_v42 = vld [vmem:[%s1460_s14 + $0xa8] sm:$0xff]  ;;  %v269_v43 = vld [vmem:[%s1460_s14 + $0xb0] sm:$0xff] }
  0x3e   : > { %1114 = vmatprep.subr.mxu0 %v287_v8  ;;  %v270_v44 = vld [vmem:[%s1460_s14 + $0xb8] sm:$0xff]  ;;  %v271_v45 = vld [vmem:[%s1460_s14 + $0xc0] sm:$0xff]  ;;  %v272_v46 = vld [vmem:[%s1460_s14 + $0xc8] sm:$0xff] }
  0x3f   : > { %1115 = vmatpush3.msra.mxu0 %v287_v8  ;;  %v273_v47 = vld [vmem:[%s1460_s14 + $0xd0] sm:$0xff]  ;;  %v274_v48 = vld [vmem:[%s1460_s14 + $0xd8] sm:$0xff]  ;;  %v275_v49 = vld [vmem:[%s1460_s14 + $0xe0] sm:$0xff] }
  0x40   : > { %1116 = vmatprep.subr.mxu0 %v286_v9  ;;  %v276_v50 = vld [vmem:[%s1460_s14 + $0xe8] sm:$0xff]  ;;  %v277_v51 = vld [vmem:[%s1460_s14 + $0xf0] sm:$0xff]  ;;  %v278_v52 = vld [vmem:[%s1460_s14 + $0xf8] sm:$0xff] }
  0x41   : > { %1117 = vmatpush3.msra.mxu0 %v286_v9  ;;  %v529_v53 = vld [vmem:[%s1763_s3 + $0x10] sm:$0xff]  ;;  %v528_v54 = vld [vmem:[%s1763_s3 + $0x8] sm:$0xff]  ;;  %v527_v55 = vld [vmem:[%s1763_s3] sm:$0xff] }
  0x42   : > { %1118 = vmatprep.subr.mxu0 %v285_v10  ;;  %1190 = vmatprep.subr.mxu1 %v529_v53  ;;  %v1573_v57 = vld [vmem:[%s1762_s2] ss:$0 sm:$0xff] }
  0x43   : > { %1119 = vmatpush3.msra.mxu0 %v285_v10  ;;  %1191 = vmatpush3.msra.mxu1 %v529_v53 }
  0x44   : > { %1120 = vmatprep.subr.mxu0 %v284_v13  ;;  %1192 = vmatprep.subr.mxu1 %v528_v54 }
  0x45   : > { %1121 = vmatpush3.msra.mxu0 %v284_v13  ;;  %1193 = vmatpush3.msra.mxu1 %v528_v54 }
  0x46   : > { %1122 = vmatprep.subr.mxu0 %v283_v15  ;;  %1194 = vmatprep.subr.mxu1 %v527_v55 }
  0x47   : > { %1123 = vmatpush3.msra.mxu0 %v283_v15  ;;  %1195 = vmatpush3.msra.mxu1 %v527_v55 }
  0x48   : > { %1124 = vmatprep.subr.mxu0 %v282_v17 }
  0x49   : > { %1125 = vmatpush3.msra.mxu0 %v282_v17 }
  0x4a   : > { %1126 = vmatprep.subr.mxu0 %v281_v19 }
  0x4b   : > { %1127 = vmatpush3.msra.mxu0 %v281_v19 }
  0x4c   : > { %1128 = vmatprep.subr.mxu0 %v280_v20 }
  0x4d   : > { %1129 = vmatpush3.msra.mxu0 %v280_v20 }
  0x4e   : > { %1130 = vmatprep.subr.mxu0 %v279_v21 }
  0x4f   : > { %1131 = vmatpush3.msra.mxu0 %v279_v21 }
  0x50   : > { %1133 = vmatmul.mubr.f32.vlgmr.msra.gmra.mxu0 %v248_v22 }
  0x51   : > { %1135 = vmatprep.mubr.f32.mxu0 %v249_v23 }
  0x54   : > { %1136 = vmatmul.mubr.f32.gmra.mxu0 %v250_v24 }
  0x55   : > { %1138 = vmatprep.mubr.f32.mxu0 %v251_v25 }
  0x58   : > { %1139 = vmatmul.mubr.f32.gmra.mxu0 %v252_v26 }
  0x59   : > { %1141 = vmatprep.mubr.f32.mxu0 %v253_v27 }
  0x5c   : > { %1142 = vmatmul.mubr.f32.gmra.mxu0 %v254_v28 }
  0x5d   : > { %1144 = vmatprep.mubr.f32.mxu0 %v255_v29 }
  0x60   : > { %1145 = vmatmul.mubr.f32.gmra.mxu0 %v256_v30 }
  0x61   : > { %1147 = vmatprep.mubr.f32.mxu0 %v257_v31 }
  0x64   : > { %1148 = vmatmul.mubr.f32.gmra.mxu0 %v258_v32 }
  0x65   : > { %1150 = vmatprep.mubr.f32.mxu0 %v259_v33 }
  0x68   : > { %1151 = vmatmul.mubr.f32.gmra.mxu0 %v260_v34 }
  0x69   : > { %1153 = vmatprep.mubr.f32.mxu0 %v261_v35 }
  0x6c   : > { %1154 = vmatmul.mubr.f32.gmra.mxu0 %v262_v36 }
  0x6d   : > { %1156 = vmatprep.mubr.f32.mxu0 %v263_v37 }
  0x70   : > { %1157 = vmatmul.mubr.f32.gmra.mxu0 %v264_v38 }
  0x71   : > { %1159 = vmatprep.mubr.f32.mxu0 %v265_v39 }
  0x74   : > { %1160 = vmatmul.mubr.f32.gmra.mxu0 %v266_v40 }
  0x75   : > { %1162 = vmatprep.mubr.f32.mxu0 %v267_v41 }
  0x78   : > { %1163 = vmatmul.mubr.f32.gmra.mxu0 %v268_v42 }
  0x79   : > { %1165 = vmatprep.mubr.f32.mxu0 %v269_v43 }
  0x7c   : > { %1166 = vmatmul.mubr.f32.gmra.mxu0 %v270_v44 }
  0x7d   : > { %1168 = vmatprep.mubr.f32.mxu0 %v271_v45 }
  0x80   : > { %1169 = vmatmul.mubr.f32.gmra.mxu0 %v272_v46 }
  0x81   : > { %1171 = vmatprep.mubr.f32.mxu0 %v273_v47 }
  0x84   : > { %1172 = vmatmul.mubr.f32.gmra.mxu0 %v274_v48 }
  0x85   : > { %1174 = vmatprep.mubr.f32.mxu0 %v275_v49 }
  0x88   : > { %1175 = vmatmul.mubr.f32.gmra.mxu0 %v276_v50 }
  0x89   : > { %1177 = vmatprep.mubr.f32.mxu0 %v277_v51 }
  0x8c   : > { %1178 = vmatmul.mubr.f32.gmra.mxu0 %v278_v52 }
 0x110   : > { %v1134_v56 = vpop.f32.mrf.mxu0 }
 0x111   : > { %v374_v60 = vadd.f32 %v1134_v56, %v1573_v57 }
 0x112   : > { %v368_v58 = vpop.f32.mrf.mxu0 }
 0x113   : > { %v369_v59 = vadd.f32 %v1573_v57, %v368_v58  ;;  %v1644_v58 = vld [vmem:[%s1764_s4] ss:$0 sm:$0xff] }
 0x114   : > { %v1137_v61 = vpop.f32.mrf.mxu0 }
 0x115   : > { %1196 = vmatprep.mubr.msk.f32.mxu1 %vm542_vm0, %v369_v59  ;;  %v384_v0 = vadd.f32 %v1137_v61, %v1573_v57 }
 0x116   : > { %v378_v62 = vpop.f32.mrf.mxu0  ;;  %1197 = vmatmul.mubr.msk.f32.vlgmr.msra.gmra.mxu1 %vm542_vm0, %v374_v60 }
 0x117   : > { %v379_v63 = vadd.f32 %v1573_v57, %v378_v62 }
 0x118   : > { %v1140_v1 = vpop.f32.mrf.mxu0 }
 0x119   : > { %1199 = vmatprep.mubr.msk.f32.mxu1 %vm542_vm0, %v379_v63  ;;  %v394_v4 = vadd.f32 %v1140_v1, %v1573_v57 }
 0x11a   : > { %v388_v2 = vpop.f32.mrf.mxu0  ;;  %1200 = vmatmul.mubr.msk.f32.gmra.mxu1 %vm542_vm0, %v384_v0 }
 0x11b   : > { %v389_v3 = vadd.f32 %v1573_v57, %v388_v2 }
 0x11c   : > { %v1143_v5 = vpop.f32.mrf.mxu0 }
 0x11d   : > { %1202 = vmatprep.mubr.msk.f32.mxu1 %vm542_vm0, %v389_v3  ;;  %v404_v8 = vadd.f32 %v1143_v5, %v1573_v57 }
 0x11e   : > { %v398_v6 = vpop.f32.mrf.mxu0  ;;  %1203 = vmatmul.mubr.msk.f32.gmra.mxu1 %vm542_vm0, %v394_v4 }
 0x11f   : > { %v399_v7 = vadd.f32 %v1573_v57, %v398_v6 }
 0x120   : > { %v1146_v9 = vpop.f32.mrf.mxu0 }
 0x121   : > { %1205 = vmatprep.mubr.msk.f32.mxu1 %vm542_vm0, %v399_v7  ;;  %v414_v12 = vadd.f32 %v1146_v9, %v1573_v57 }
 0x122   : > { %v408_v10 = vpop.f32.mrf.mxu0  ;;  %1206 = vmatmul.mubr.msk.f32.gmra.mxu1 %vm542_vm0, %v404_v8 }
 0x123   : > { %v409_v11 = vadd.f32 %v1573_v57, %v408_v10 }
 0x124   : > { %v1149_v13 = vpop.f32.mrf.mxu0 }
 0x125   : > { %1208 = vmatprep.mubr.msk.f32.mxu1 %vm542_vm0, %v409_v11  ;;  %v424_v16 = vadd.f32 %v1149_v13, %v1573_v57 }
 0x126   : > { %v418_v14 = vpop.f32.mrf.mxu0  ;;  %1209 = vmatmul.mubr.msk.f32.gmra.mxu1 %vm542_vm0, %v414_v12 }
 0x127   : > { %v419_v15 = vadd.f32 %v1573_v57, %v418_v14 }
 0x128   : > { %v1152_v17 = vpop.f32.mrf.mxu0 }
 0x129   : > { %1211 = vmatprep.mubr.msk.f32.mxu1 %vm542_vm0, %v419_v15  ;;  %v434_v20 = vadd.f32 %v1152_v17, %v1573_v57 }
 0x12a   : > { %v428_v18 = vpop.f32.mrf.mxu0  ;;  %1212 = vmatmul.mubr.msk.f32.gmra.mxu1 %vm542_vm0, %v424_v16 }
 0x12b   : > { %v429_v19 = vadd.f32 %v1573_v57, %v428_v18 }
 0x12c   : > { %v1155_v21 = vpop.f32.mrf.mxu0 }
 0x12d   : > { %1214 = vmatprep.mubr.msk.f32.mxu1 %vm542_vm0, %v429_v19  ;;  %v444_v24 = vadd.f32 %v1155_v21, %v1573_v57 }
 0x12e   : > { %v438_v22 = vpop.f32.mrf.mxu0  ;;  %1215 = vmatmul.mubr.msk.f32.gmra.mxu1 %vm542_vm0, %v434_v20 }
 0x12f   : > { %v439_v23 = vadd.f32 %v1573_v57, %v438_v22 }
 0x130   : > { %v1158_v25 = vpop.f32.mrf.mxu0 }
 0x131   : > { %1217 = vmatprep.mubr.msk.f32.mxu1 %vm542_vm0, %v439_v23  ;;  %v454_v28 = vadd.f32 %v1158_v25, %v1573_v57 }
 0x132   : > { %v448_v26 = vpop.f32.mrf.mxu0  ;;  %1218 = vmatmul.mubr.msk.f32.gmra.mxu1 %vm542_vm0, %v444_v24 }
 0x133   : > { %v449_v27 = vadd.f32 %v1573_v57, %v448_v26 }
 0x134   : > { %v1161_v29 = vpop.f32.mrf.mxu0 }
 0x135   : > { %1220 = vmatprep.mubr.msk.f32.mxu1 %vm542_vm0, %v449_v27  ;;  %v464_v32 = vadd.f32 %v1161_v29, %v1573_v57 }
 0x136   : > { %v458_v30 = vpop.f32.mrf.mxu0  ;;  %1221 = vmatmul.mubr.msk.f32.gmra.mxu1 %vm542_vm0, %v454_v28 }
 0x137   : > { %v459_v31 = vadd.f32 %v1573_v57, %v458_v30 }
 0x138   : > { %v1164_v33 = vpop.f32.mrf.mxu0 }
 0x139   : > { %1223 = vmatprep.mubr.msk.f32.mxu1 %vm542_vm0, %v459_v31  ;;  %v474_v36 = vadd.f32 %v1164_v33, %v1573_v57 }
 0x13a   : > { %v468_v34 = vpop.f32.mrf.mxu0  ;;  %1224 = vmatmul.mubr.msk.f32.gmra.mxu1 %vm542_vm0, %v464_v32 }
 0x13b   : > { %v469_v35 = vadd.f32 %v1573_v57, %v468_v34 }
 0x13c   : > { %v1167_v37 = vpop.f32.mrf.mxu0 }
 0x13d   : > { %1226 = vmatprep.mubr.msk.f32.mxu1 %vm542_vm0, %v469_v35  ;;  %v484_v40 = vadd.f32 %v1167_v37, %v1573_v57 }
 0x13e   : > { %v478_v38 = vpop.f32.mrf.mxu0  ;;  %1227 = vmatmul.mubr.msk.f32.gmra.mxu1 %vm542_vm0, %v474_v36 }
 0x13f   : > { %v479_v39 = vadd.f32 %v1573_v57, %v478_v38 }
 0x140   : > { %v1170_v41 = vpop.f32.mrf.mxu0 }
 0x141   : > { %1229 = vmatprep.mubr.msk.f32.mxu1 %vm542_vm0, %v479_v39  ;;  %v494_v44 = vadd.f32 %v1170_v41, %v1573_v57 }
 0x142   : > { %v488_v42 = vpop.f32.mrf.mxu0  ;;  %1230 = vmatmul.mubr.msk.f32.gmra.mxu1 %vm542_vm0, %v484_v40 }
 0x143   : > { %v489_v43 = vadd.f32 %v1573_v57, %v488_v42 }
 0x144   : > { %v1173_v45 = vpop.f32.mrf.mxu0 }
 0x145   : > { %1232 = vmatprep.mubr.msk.f32.mxu1 %vm542_vm0, %v489_v43  ;;  %v504_v48 = vadd.f32 %v1173_v45, %v1573_v57 }
 0x146   : > { %v498_v46 = vpop.f32.mrf.mxu0  ;;  %1233 = vmatmul.mubr.msk.f32.gmra.mxu1 %vm542_vm0, %v494_v44 }
 0x147   : > { %v499_v47 = vadd.f32 %v1573_v57, %v498_v46 }
 0x148   : > { %v1176_v49 = vpop.f32.mrf.mxu0 }
 0x149   : > { %1235 = vmatprep.mubr.msk.f32.mxu1 %vm542_vm0, %v499_v47  ;;  %v514_v52 = vadd.f32 %v1176_v49, %v1573_v57 }
 0x14a   : > { %v508_v50 = vpop.f32.mrf.mxu0  ;;  %1236 = vmatmul.mubr.msk.f32.gmra.mxu1 %vm542_vm0, %v504_v48 }
 0x14b   : > { %v509_v51 = vadd.f32 %v1573_v57, %v508_v50 }
 0x14c   : > { %v1179_v53 = vpop.f32.mrf.mxu0 }
 0x14d   : > { %1238 = vmatprep.mubr.msk.f32.mxu1 %vm542_vm0, %v509_v51  ;;  %v524_v56 = vadd.f32 %v1179_v53, %v1573_v57 }
 0x14e   : > { %v518_v54 = vpop.f32.mrf.mxu0  ;;  %1239 = vmatmul.mubr.msk.f32.gmra.mxu1 %vm542_vm0, %v514_v52 }
 0x14f   : > { %v519_v55 = vadd.f32 %v1573_v57, %v518_v54 }
 0x151   : > { %1241 = vmatprep.mubr.msk.f32.mxu1 %vm542_vm0, %v519_v55 }
 0x152   : > { %1242 = vmatmul.mubr.msk.f32.gmra.mxu1 %vm542_vm0, %v524_v56 }
 0x1d6   : > { %v1198_v57 = vpop.f32.mrf.mxu1 }
 0x1d7   : > { %v711_v59 = vadd.f32 %v1198_v57, %v1644_v58 }
 0x1d8   : > { %v705_v60 = vpop.f32.mrf.mxu1 }
 0x1d9   : > { %866 = vst.msk [vmem:[%s1649_s16 + $0x8] sm:$0xff] %vm864_vm1, %v711_v59  ;;  %v706_v61 = vadd.f32 %v1644_v58, %v705_v60 }
 0x1da   : > { %v1201_v62 = vpop.f32.mrf.mxu1 }
 0x1db   : > { %865 = vst.msk [vmem:[%s1649_s16] sm:$0xff] %vm864_vm1, %v706_v61  ;;  %v721_v63 = vadd.f32 %v1201_v62, %v1644_v58 }
 0x1dc   : > { %v715_v0 = vpop.f32.mrf.mxu1 }
 0x1dd   : > { %868 = vst.msk [vmem:[%s1649_s16 + $0x18] sm:$0xff] %vm864_vm1, %v721_v63  ;;  %v716_v1 = vadd.f32 %v1644_v58, %v715_v0 }
 0x1de   : > { %v1204_v2 = vpop.f32.mrf.mxu1 }
 0x1df   : > { %867 = vst.msk [vmem:[%s1649_s16 + $0x10] sm:$0xff] %vm864_vm1, %v716_v1  ;;  %v731_v3 = vadd.f32 %v1204_v2, %v1644_v58 }
 0x1e0   : > { %v725_v4 = vpop.f32.mrf.mxu1 }
 0x1e1   : > { %870 = vst.msk [vmem:[%s1649_s16 + $0x28] sm:$0xff] %vm864_vm1, %v731_v3  ;;  %v726_v5 = vadd.f32 %v1644_v58, %v725_v4 }
 0x1e2   : > { %v1207_v6 = vpop.f32.mrf.mxu1 }
 0x1e3   : > { %869 = vst.msk [vmem:[%s1649_s16 + $0x20] sm:$0xff] %vm864_vm1, %v726_v5  ;;  %v741_v7 = vadd.f32 %v1207_v6, %v1644_v58 }
 0x1e4   : > { %v735_v8 = vpop.f32.mrf.mxu1 }
 0x1e5   : > { %872 = vst.msk [vmem:[%s1649_s16 + $0x38] sm:$0xff] %vm864_vm1, %v741_v7  ;;  %v736_v9 = vadd.f32 %v1644_v58, %v735_v8 }
 0x1e6   : > { %v1210_v10 = vpop.f32.mrf.mxu1 }
 0x1e7   : > { %871 = vst.msk [vmem:[%s1649_s16 + $0x30] sm:$0xff] %vm864_vm1, %v736_v9  ;;  %v751_v11 = vadd.f32 %v1210_v10, %v1644_v58 }
 0x1e8   : > { %v745_v12 = vpop.f32.mrf.mxu1 }
 0x1e9   : > { %874 = vst.msk [vmem:[%s1649_s16 + $0x48] sm:$0xff] %vm864_vm1, %v751_v11  ;;  %v746_v13 = vadd.f32 %v1644_v58, %v745_v12 }
 0x1ea   : > { %v1213_v14 = vpop.f32.mrf.mxu1 }
 0x1eb   : > { %873 = vst.msk [vmem:[%s1649_s16 + $0x40] sm:$0xff] %vm864_vm1, %v746_v13  ;;  %v761_v15 = vadd.f32 %v1213_v14, %v1644_v58 }
 0x1ec   : > { %v755_v16 = vpop.f32.mrf.mxu1 }
 0x1ed   : > { %876 = vst.msk [vmem:[%s1649_s16 + $0x58] sm:$0xff] %vm864_vm1, %v761_v15  ;;  %v756_v17 = vadd.f32 %v1644_v58, %v755_v16 }
 0x1ee   : > { %v1216_v18 = vpop.f32.mrf.mxu1 }
 0x1ef   : > { %875 = vst.msk [vmem:[%s1649_s16 + $0x50] sm:$0xff] %vm864_vm1, %v756_v17  ;;  %v771_v19 = vadd.f32 %v1216_v18, %v1644_v58 }
 0x1f0   : > { %v765_v20 = vpop.f32.mrf.mxu1 }
 0x1f1   : > { %878 = vst.msk [vmem:[%s1649_s16 + $0x68] sm:$0xff] %vm864_vm1, %v771_v19  ;;  %v766_v21 = vadd.f32 %v1644_v58, %v765_v20 }
 0x1f2   : > { %v1219_v22 = vpop.f32.mrf.mxu1 }
 0x1f3   : > { %877 = vst.msk [vmem:[%s1649_s16 + $0x60] sm:$0xff] %vm864_vm1, %v766_v21  ;;  %v781_v23 = vadd.f32 %v1219_v22, %v1644_v58 }
 0x1f4   : > { %v775_v24 = vpop.f32.mrf.mxu1 }
 0x1f5   : > { %880 = vst.msk [vmem:[%s1649_s16 + $0x78] sm:$0xff] %vm864_vm1, %v781_v23  ;;  %v776_v25 = vadd.f32 %v1644_v58, %v775_v24 }
 0x1f6   : > { %v1222_v26 = vpop.f32.mrf.mxu1 }
 0x1f7   : > { %879 = vst.msk [vmem:[%s1649_s16 + $0x70] sm:$0xff] %vm864_vm1, %v776_v25  ;;  %v791_v27 = vadd.f32 %v1222_v26, %v1644_v58 }
 0x1f8   : > { %v785_v28 = vpop.f32.mrf.mxu1 }
 0x1f9   : > { %882 = vst.msk [vmem:[%s1649_s16 + $0x88] sm:$0xff] %vm864_vm1, %v791_v27  ;;  %v786_v29 = vadd.f32 %v1644_v58, %v785_v28 }
 0x1fa   : > { %v1225_v30 = vpop.f32.mrf.mxu1 }
 0x1fb   : > { %881 = vst.msk [vmem:[%s1649_s16 + $0x80] sm:$0xff] %vm864_vm1, %v786_v29  ;;  %v801_v31 = vadd.f32 %v1225_v30, %v1644_v58 }
 0x1fc   : > { %v795_v32 = vpop.f32.mrf.mxu1 }
 0x1fd   : > { %884 = vst.msk [vmem:[%s1649_s16 + $0x98] sm:$0xff] %vm864_vm1, %v801_v31  ;;  %v796_v33 = vadd.f32 %v1644_v58, %v795_v32 }
 0x1fe   : > { %v1228_v34 = vpop.f32.mrf.mxu1 }
 0x1ff   : > { %883 = vst.msk [vmem:[%s1649_s16 + $0x90] sm:$0xff] %vm864_vm1, %v796_v33  ;;  %v811_v35 = vadd.f32 %v1228_v34, %v1644_v58 }
 0x200   : > { %v805_v36 = vpop.f32.mrf.mxu1 }
 0x201   : > { %886 = vst.msk [vmem:[%s1649_s16 + $0xa8] sm:$0xff] %vm864_vm1, %v811_v35  ;;  %v806_v37 = vadd.f32 %v1644_v58, %v805_v36 }
 0x202   : > { %v1231_v38 = vpop.f32.mrf.mxu1 }
 0x203   : > { %885 = vst.msk [vmem:[%s1649_s16 + $0xa0] sm:$0xff] %vm864_vm1, %v806_v37  ;;  %v821_v39 = vadd.f32 %v1231_v38, %v1644_v58 }
 0x204   : > { %v815_v40 = vpop.f32.mrf.mxu1 }
 0x205   : > { %888 = vst.msk [vmem:[%s1649_s16 + $0xb8] sm:$0xff] %vm864_vm1, %v821_v39  ;;  %v816_v41 = vadd.f32 %v1644_v58, %v815_v40 }
 0x206   : > { %v1234_v42 = vpop.f32.mrf.mxu1 }
 0x207   : > { %887 = vst.msk [vmem:[%s1649_s16 + $0xb0] sm:$0xff] %vm864_vm1, %v816_v41  ;;  %v831_v43 = vadd.f32 %v1234_v42, %v1644_v58 }
 0x208   : > { %v825_v44 = vpop.f32.mrf.mxu1 }
 0x209   : > { %890 = vst.msk [vmem:[%s1649_s16 + $0xc8] sm:$0xff] %vm864_vm1, %v831_v43  ;;  %v826_v45 = vadd.f32 %v1644_v58, %v825_v44 }
 0x20a   : > { %v1237_v46 = vpop.f32.mrf.mxu1 }
 0x20b   : > { %889 = vst.msk [vmem:[%s1649_s16 + $0xc0] sm:$0xff] %vm864_vm1, %v826_v45  ;;  %v841_v47 = vadd.f32 %v1237_v46, %v1644_v58 }
 0x20c   : > { %v835_v48 = vpop.f32.mrf.mxu1 }
 0x20d   : > { %892 = vst.msk [vmem:[%s1649_s16 + $0xd8] sm:$0xff] %vm864_vm1, %v841_v47  ;;  %v836_v49 = vadd.f32 %v1644_v58, %v835_v48 }
 0x20e   : > { %v1240_v50 = vpop.f32.mrf.mxu1 }
 0x20f   : > { %891 = vst.msk [vmem:[%s1649_s16 + $0xd0] sm:$0xff] %vm864_vm1, %v836_v49  ;;  %v851_v51 = vadd.f32 %v1240_v50, %v1644_v58 }
 0x210   : > { %v845_v52 = vpop.f32.mrf.mxu1 }
 0x211   : > { %894 = vst.msk [vmem:[%s1649_s16 + $0xe8] sm:$0xff] %vm864_vm1, %v851_v51  ;;  %v846_v53 = vadd.f32 %v1644_v58, %v845_v52 }
 0x212   : > { %v1243_v54 = vpop.f32.mrf.mxu1 }
 0x213   : > { %893 = vst.msk [vmem:[%s1649_s16 + $0xe0] sm:$0xff] %vm864_vm1, %v846_v53  ;;  %v861_v55 = vadd.f32 %v1243_v54, %v1644_v58 }
 0x214   : > { %v855_v56 = vpop.f32.mrf.mxu1 }
 0x215   : > { %896 = vst.msk [vmem:[%s1649_s16 + $0xf8] sm:$0xff] %vm864_vm1, %v861_v55  ;;  %v856_v57 = vadd.f32 %v1644_v58, %v855_v56 }
 0x217   : > { %895 = vst.msk [vmem:[%s1649_s16 + $0xf0] sm:$0xff] %vm864_vm1, %v856_v57 }
 0x218 PF: > { %p15_p9 = scmp.ge.s32.totalorder %s1402_s23, 4   ;;  %s1771_s18 = smov %s1339_s19 }
 0x219   : > { %s1772_s19 = smov %s1343_s20  ;;  %s1773_s20 = smov %s1412_s26 }
 0x21a   : > { %s1774_s21 = smov %s1402_s23  ;;  %17 = sbr.rel (!%p15_p9) target bundleno = 3 (0x3), region = 80 }
 0x21f   :  { %919 = vsyncpa [#allocation3], 1 }
 0x220   :  { %921 = vsyncpa [#allocation3 + $0x1], 1 }

</bundles_post_ra>
